<compile_context>
chip_gen: v7x
topology: tpu7x:2x2x1
jax: 0.10.0
libtpu: 0.0.40
codegen_flags: <defaults>
</compile_context>

<pallas_src>
import functools

import jax
import jax.numpy as jnp
from jax.experimental import pallas as pl
from jax.experimental.pallas import tpu as pltpu

# ----------------------------- model config ---------------------------------
FIELD_NUM = 4
EMB_DIM = 8
ID_VOCAB = 100
VPAD = 128                      # per-field vocab rows padded for aligned concat / MXU K
MLP_DIMS = (64, 32)             # two hidden layers
NUM_CROSS = 3
D0 = FIELD_NUM * EMB_DIM        # embedding_output_dim = 32
H1, H2 = MLP_DIMS
AUX_ROWS = D0 + H2 + D0         # id_emb(32) | dnn_out(32) | cross_out(32) = 96
BATCH = 8
TILE_B_MAX = 512                # cap on batch rows (lane axis) per grid step


def _round_up(x, m):
    return ((x + m - 1) // m) * m


# ------------------------------ Pallas kernel --------------------------------
def dcn_kernel(ids_ref, combo_ref, b1_ref, w2T_ref, b2_ref,
               cw_ref, cb_ref, pwT_ref, pb_ref, logits_ref, *aux_refs,
               with_aux: bool):
    """All activations are (features, TILE_B): batch on the lane axis. f32 math."""
    ids = ids_ref[...]                                        # (F, TB) int32
    tb = ids.shape[1]
    k_rows = FIELD_NUM * VPAD                                 # 512

    # ---- fused embedding gather + MLP layer 1 (block-diagonal one-hot matmul) ----
    # onehot[r, c] = 1  iff  r == ids[r // VPAD, c] + (r // VPAD) * VPAD
    row_iota = jax.lax.broadcasted_iota(jnp.int32, (k_rows, tb), 0)
    targets = jnp.concatenate(
        [jnp.broadcast_to(ids[f:f + 1, :] + f * VPAD, (VPAD, tb))
         for f in range(FIELD_NUM)], axis=0)                  # (4*VPAD, TB) int32
    onehot = (row_iota == targets).astype(jnp.float32)        # built directly, no where()

    # combo = [blockdiag(embT); W1^T . blockdiag(embT)]  -> one MXU dot gives x0 and h1_pre
    gx = jnp.dot(combo_ref[...], onehot,
                 preferred_element_type=jnp.float32)          # (D0+H1, TB) f32
    x0 = gx[:D0, :]                                           # (D0, TB)
    h1 = jnp.maximum(gx[D0:, :] + b1_ref[...], 0.0)           # (H1, TB)

    # ---- MLP layer 2 ----
    dnn = jnp.maximum(
        jnp.dot(w2T_ref[...], h1, preferred_element_type=jnp.float32)
        + b2_ref[...], 0.0)                                   # (H2, TB)

    # ---- CrossNet: x_{l+1} = x0 * (x_l . w_l) + b_l + x_l  (XLU sublane reduce) ----
    xl = x0
    for l in range(NUM_CROSS):                                # static unroll
        w_l = cw_ref[l]                                       # (D0, 1) f32
        b_l = cb_ref[l]                                       # (D0, 1) f32
        s = jnp.sum(xl * w_l, axis=0, keepdims=True)          # (1, TB)
        xl = x0 * s + b_l + xl

    # ---- predict_dense on concat([dnn, cross]): VPU mul + sublane reduce ----
    pwd = pwT_ref[:H2, :]                                     # (H2, 1)
    pwc = pwT_ref[H2:, :]                                     # (D0, 1)
    logit = (jnp.sum(dnn * pwd, axis=0, keepdims=True)
             + jnp.sum(xl * pwc, axis=0, keepdims=True)
             + pb_ref[0, 0])                                  # (1, TB)
    logits_ref[...] = logit.astype(logits_ref.dtype)          # lane-dense store

    if with_aux:
        (aux_ref,) = aux_refs                                 # single merged slab
        aux_ref[...] = jnp.concatenate([x0, dnn, xl],
                                       axis=0).astype(aux_ref.dtype)  # (96, TB) bf16


# --------------------------- parameter preparation ---------------------------
def _prep_params(p):
    """Batch-on-lanes layout; block-diagonal embedding table with W1 folded in."""
    f32 = jnp.float32
    embT = p["emb"].astype(f32).T                             # (E, V)
    blk = jnp.zeros((D0, FIELD_NUM * VPAD), f32)              # block-diagonal table
    for f in range(FIELD_NUM):
        blk = blk.at[f * EMB_DIM:(f + 1) * EMB_DIM,
                     f * VPAD:f * VPAD + ID_VOCAB].set(embT)
    w1T = p["w1"].astype(f32).T                               # (H1, D0)
    combo = jnp.concatenate(
        [blk, jnp.dot(w1T, blk, precision=jax.lax.Precision.HIGHEST)],
        axis=0)                                               # (D0+H1, 4*VPAD)
    return {
        "combo": combo,
        "b1": p["b1"].reshape(H1, 1).astype(f32),
        "w2T": p["w2"].T.astype(f32),                         # (H2, H1)
        "b2": p["b2"].reshape(H2, 1).astype(f32),
        "cw3": p["cw"].reshape(NUM_CROSS, D0, 1).astype(f32),
        "cb3": p["cb"].reshape(NUM_CROSS, D0, 1).astype(f32),
        "pwT": p["pw"].astype(f32),                           # (H2+D0, 1)
        "pb": p["pb"].reshape(1, 1).astype(f32),              # scalar -> SMEM
    }


# ------------------------------ forward wrapper -------------------------------
@functools.partial(jax.jit, static_argnames=("return_aux", "tile_b"))
def dcn_forward(feat_ids, params, return_aux=True, tile_b=None):
    """feat_ids: (B, field_num) int32. Returns (logits, out_dict)."""
    B = feat_ids.shape[0]
    # Adaptive tiling: lane-dense (multiple of 128) but no over-padding for small B.
    # For large B this yields >=2 tiles so dimension_semantics=("parallel",) can
    # shard the batch over both v7x TensorCores.
    if tile_b is None:
        tile_b = min(TILE_B_MAX, _round_up(max(B, 1), 128))
    padded_b = _round_up(B, tile_b)
    n_tiles = padded_b // tile_b

    kp = _prep_params(params)
    # Transposed + zero-padded ids (index 0 is a valid row; padding is sliced off).
    ids_t = jnp.zeros((FIELD_NUM, padded_b), jnp.int32).at[:, :B].set(feat_ids.T)

    def resident(shape):
        # Constant block index -> fetched once, stays VMEM-resident across the grid.
        return pl.BlockSpec(shape, lambda i: (0,) * len(shape))

    in_specs = [
        pl.BlockSpec((FIELD_NUM, tile_b), lambda i: (0, i)),   # ids (batch on lanes)
        resident((D0 + H1, FIELD_NUM * VPAD)),                 # block-diag emb + W1 fold
        resident((H1, 1)),                                     # b1
        resident((H2, H1)), resident((H2, 1)),                 # MLP layer 2
        resident((NUM_CROSS, D0, 1)),                          # CrossNet weights
        resident((NUM_CROSS, D0, 1)),                          # CrossNet biases
        resident((H2 + D0, 1)),                                # predict_dense weight
        pl.BlockSpec(memory_space=pltpu.MemorySpace.SMEM),     # predict_dense bias
    ]

    out_shape = [jax.ShapeDtypeStruct((1, padded_b), jnp.float32)]
    out_specs = [pl.BlockSpec((1, tile_b), lambda i: (0, i))]
    if return_aux:
        # Single merged bf16 slab: rows [0:32) id_emb, [32:64) dnn_out, [64:96) cross_out.
        out_shape.append(jax.ShapeDtypeStruct((AUX_ROWS, padded_b), jnp.bfloat16))
        out_specs.append(pl.BlockSpec((AUX_ROWS, tile_b), lambda i: (0, i)))

    outs = pl.pallas_call(
        functools.partial(dcn_kernel, with_aux=return_aux),
        out_shape=tuple(out_shape),
        grid_spec=pltpu.PrefetchScalarGridSpec(
            num_scalar_prefetch=0,
            grid=(n_tiles,),
            in_specs=in_specs,
            out_specs=tuple(out_specs),
        ),
        compiler_params=pltpu.CompilerParams(
            dimension_semantics=("parallel",),     # v7x: split batch tiles over 2 TCs
            vmem_limit_bytes=32 * 1024 * 1024,
        ),
    )(ids_t, kp["combo"], kp["b1"], kp["w2T"], kp["b2"],
      kp["cw3"], kp["cb3"], kp["pwT"], kp["pb"])

    logits = outs[0][0, :B]
    if not return_aux:
        return logits, {}

    aux = outs[1][:, :B]                 # slice padding off BEFORE transposing
    out_dict = {
        "id_emb": aux[:D0, :].T,         # (B, D0)  bf16
        "dnn_out": aux[D0:D0 + H2, :].T,  # (B, H2)  bf16
        "cross_out": aux[D0 + H2:, :].T,  # (B, D0)  bf16
    }
    return logits, out_dict


# ------------------------- deterministic parameter init ----------------------
def init_params(key):
    ks = jax.random.split(key, 10)

    def lin_init(k, fan_in, shape):
        bound = 1.0 / jnp.sqrt(fan_in)
        return jax.random.uniform(k, shape, jnp.float32, -bound, bound)

    return {
        # torch.nn.init.uniform_(emb, -0.05, 0.05)
        "emb": jax.random.uniform(ks[0], (ID_VOCAB, EMB_DIM), jnp.float32, -0.05, 0.05),
        # MLP layer 1: Linear(D0 -> H1)
        "w1": lin_init(ks[1], D0, (D0, H1)),
        "b1": lin_init(ks[2], D0, (1, H1)),
        # MLP layer 2: Linear(H1 -> H2)
        "w2": lin_init(ks[3], H1, (H1, H2)),
        "b2": lin_init(ks[4], H1, (1, H2)),
        # CrossNet: per-layer weight/bias vectors of size D0
        "cw": lin_init(ks[5], D0, (NUM_CROSS, D0)),
        "cb": jnp.zeros((NUM_CROSS, D0), jnp.float32),
        # predict_dense: Linear(H2 + D0 -> 1)
        "pw": lin_init(ks[6], H2 + D0, (H2 + D0, 1)),
        "pb": lin_init(ks[7], H2 + D0, (1, 1)),
    }


# ------------------------------ pure-JAX reference ----------------------------
def dcn_reference(feat_ids, p):
    """Pure-f32 semantics of the PyTorch module (eval mode)."""
    x0 = jnp.take(p["emb"], feat_ids, axis=0).reshape(feat_ids.shape[0], D0)
    h1 = jnp.maximum(x0 @ p["w1"] + p["b1"], 0.0)
    dnn = jnp.maximum(h1 @ p["w2"] + p["b2"], 0.0)
    xl = x0
    for l in range(NUM_CROSS):
        s = jnp.sum(xl * p["cw"][l][None, :], axis=-1, keepdims=True)
        xl = x0 * s + p["cb"][l][None, :] + xl
    out = jnp.concatenate([dnn, xl], axis=1)
    logits = jnp.sum(out * p["pw"][:, 0][None, :], axis=1) + p["pb"][0, 0]
    return logits, x0, dnn, xl


# ------------------------------------ main ------------------------------------
if __name__ == "__main__":
    key = jax.random.PRNGKey(0)
    pkey, dkey = jax.random.split(key)
    params = init_params(pkey)
    feat_ids = jax.random.randint(dkey, (BATCH, FIELD_NUM), 0, ID_VOCAB, jnp.int32)

    # Full path (returns out_dict like the PyTorch module) and logits-only fast path.
    logits, out_dict = jax.block_until_ready(
        dcn_forward(feat_ids, params, return_aux=True))
    logits_fast, _ = jax.block_until_ready(
        dcn_forward(feat_ids, params, return_aux=False))

    ref_logits, ref_x0, ref_dnn, ref_cross = dcn_reference(feat_ids, params)

    assert logits.shape == (BATCH,)
    assert jnp.allclose(logits, ref_logits, atol=2e-3, rtol=2e-3), "logits mismatch"
    assert jnp.allclose(logits_fast, logits, atol=1e-5, rtol=1e-5), "fast path mismatch"
    assert jnp.allclose(out_dict["id_emb"].astype(jnp.float32), ref_x0,
                        atol=2e-3, rtol=2e-2), "id_emb mismatch"
    assert jnp.allclose(out_dict["dnn_out"].astype(jnp.float32), ref_dnn,
                        atol=1e-2, rtol=2e-2), "dnn_out mismatch"
    assert jnp.allclose(out_dict["cross_out"].astype(jnp.float32), ref_cross,
                        atol=1e-2, rtol=2e-2), "cross_out mismatch"

    print("KERNEL_OK")
</pallas_src>

<mosaic_0001>
module attributes {stable_mosaic.version = 11 : i64} {
  func.func @dcn_kernel(%arg0: i32, %arg1: memref<4x128xi32, #tpu.memory_space<vmem>>, %arg2: memref<96x512xf32, #tpu.memory_space<vmem>>, %arg3: memref<64x1xf32, #tpu.memory_space<vmem>>, %arg4: memref<32x64xf32, #tpu.memory_space<vmem>>, %arg5: memref<32x1xf32, #tpu.memory_space<vmem>>, %arg6: memref<3x32x1xf32, #tpu.memory_space<vmem>>, %arg7: memref<3x32x1xf32, #tpu.memory_space<vmem>>, %arg8: memref<64x1xf32, #tpu.memory_space<vmem>>, %arg9: memref<1x1xf32, #tpu.memory_space<smem>>, %arg10: memref<1x128xf32, #tpu.memory_space<vmem>>, %arg11: memref<96x128xbf16, #tpu.memory_space<vmem>>) attributes {dimension_semantics = [#tpu.dimension_semantics<parallel>], iteration_bounds = array<i64: 1>, scalar_prefetch = 0 : i64, scratch_operands = 0 : i64, tpu.core_type = #tpu.core_type<tc>, window_params = [{transform_indices = @transform_0, window_bounds = array<i64: 4, 128>}, {pipeline_mode = #tpu.pipeline_mode<synchronous>, transform_indices = @transform_1, window_bounds = array<i64: 96, 512>}, {pipeline_mode = #tpu.pipeline_mode<synchronous>, transform_indices = @transform_2, window_bounds = array<i64: 64, 1>}, {pipeline_mode = #tpu.pipeline_mode<synchronous>, transform_indices = @transform_3, window_bounds = array<i64: 32, 64>}, {pipeline_mode = #tpu.pipeline_mode<synchronous>, transform_indices = @transform_4, window_bounds = array<i64: 32, 1>}, {pipeline_mode = #tpu.pipeline_mode<synchronous>, transform_indices = @transform_5, window_bounds = array<i64: 3, 32, 1>}, {pipeline_mode = #tpu.pipeline_mode<synchronous>, transform_indices = @transform_6, window_bounds = array<i64: 3, 32, 1>}, {pipeline_mode = #tpu.pipeline_mode<synchronous>, transform_indices = @transform_7, window_bounds = array<i64: 64, 1>}, {transform_indices = @transform_8, window_bounds = array<i64: 1, 1>}, {transform_indices = @transform_9, window_bounds = array<i64: 1, 128>}, {transform_indices = @transform_10, window_bounds = array<i64: 96, 128>}]} {
    %c0 = arith.constant 0 : index
    %c0_0 = arith.constant 0 : index
    %0 = vector.load %arg1[%c0, %c0_0] : memref<4x128xi32, #tpu.memory_space<vmem>>, vector<4x128xi32>
    %1 = tpu.iota {dimensions = array<i32: 0>} : vector<512x128xi32>
    %2 = vector.extract_strided_slice %0 {offsets = [0, 0], sizes = [1, 128], strides = [1, 1]} : vector<4x128xi32> to vector<1x128xi32>
    %c0_i32 = arith.constant 0 : i32
    %3 = vector.broadcast %c0_i32 : i32 to vector<1x128xi32>
    %4 = arith.addi %2, %3 : vector<1x128xi32>
    %5 = vector.shape_cast %4 : vector<1x128xi32> to vector<1x128xi32>
    %6 = vector.broadcast %5 : vector<1x128xi32> to vector<128x128xi32>
    %7 = vector.extract_strided_slice %0 {offsets = [1, 0], sizes = [1, 128], strides = [1, 1]} : vector<4x128xi32> to vector<1x128xi32>
    %c128_i32 = arith.constant 128 : i32
    %8 = vector.broadcast %c128_i32 : i32 to vector<1x128xi32>
    %9 = arith.addi %7, %8 : vector<1x128xi32>
    %10 = vector.shape_cast %9 : vector<1x128xi32> to vector<1x128xi32>
    %11 = vector.broadcast %10 : vector<1x128xi32> to vector<128x128xi32>
    %12 = vector.extract_strided_slice %0 {offsets = [2, 0], sizes = [1, 128], strides = [1, 1]} : vector<4x128xi32> to vector<1x128xi32>
    %c256_i32 = arith.constant 256 : i32
    %13 = vector.broadcast %c256_i32 : i32 to vector<1x128xi32>
    %14 = arith.addi %12, %13 : vector<1x128xi32>
    %15 = vector.shape_cast %14 : vector<1x128xi32> to vector<1x128xi32>
    %16 = vector.broadcast %15 : vector<1x128xi32> to vector<128x128xi32>
    %17 = vector.extract_strided_slice %0 {offsets = [3, 0], sizes = [1, 128], strides = [1, 1]} : vector<4x128xi32> to vector<1x128xi32>
    %c384_i32 = arith.constant 384 : i32
    %18 = vector.broadcast %c384_i32 : i32 to vector<1x128xi32>
    %19 = arith.addi %17, %18 : vector<1x128xi32>
    %20 = vector.shape_cast %19 : vector<1x128xi32> to vector<1x128xi32>
    %21 = vector.broadcast %20 : vector<1x128xi32> to vector<128x128xi32>
    %22 = tpu.concatenate %6, %11, %16, %21 in 0 : vector<128x128xi32>, vector<128x128xi32>, vector<128x128xi32>, vector<128x128xi32> -> vector<512x128xi32>
    %23 = arith.cmpi eq, %1, %22 : vector<512x128xi32>
    %24 = arith.extui %23 : vector<512x128xi1> to vector<512x128xi32>
    %25 = arith.sitofp %24 : vector<512x128xi32> to vector<512x128xf32>
    %c0_1 = arith.constant 0 : index
    %c0_2 = arith.constant 0 : index
    %26 = vector.load %arg2[%c0_1, %c0_2] : memref<96x512xf32, #tpu.memory_space<vmem>>, vector<96x512xf32>
    %cst = arith.constant dense<0.000000e+00> : vector<96x128xf32>
    %27 = tpu.matmul %26, %25, %cst {dimension_numbers = #tpu.dot_dimension_numbers<[1], [0], [0], [1], [0, 0, 1, 1], [], []>} : vector<96x512xf32>, vector<512x128xf32>, vector<96x128xf32> -> vector<96x128xf32>
    %28 = vector.extract_strided_slice %27 {offsets = [0, 0], sizes = [32, 128], strides = [1, 1]} : vector<96x128xf32> to vector<32x128xf32>
    %29 = vector.extract_strided_slice %27 {offsets = [32, 0], sizes = [64, 128], strides = [1, 1]} : vector<96x128xf32> to vector<64x128xf32>
    %c0_3 = arith.constant 0 : index
    %c0_4 = arith.constant 0 : index
    %30 = vector.load %arg3[%c0_3, %c0_4] : memref<64x1xf32, #tpu.memory_space<vmem>>, vector<64x1xf32>
    %31 = vector.broadcast %30 : vector<64x1xf32> to vector<64x128xf32>
    %32 = arith.addf %29, %31 : vector<64x128xf32>
    %cst_5 = arith.constant 0.000000e+00 : f32
    %33 = vector.broadcast %cst_5 : f32 to vector<64x128xf32>
    %34 = arith.maximumf %32, %33 : vector<64x128xf32>
    %c0_6 = arith.constant 0 : index
    %c0_7 = arith.constant 0 : index
    %35 = vector.load %arg4[%c0_6, %c0_7] : memref<32x64xf32, #tpu.memory_space<vmem>>, vector<32x64xf32>
    %cst_8 = arith.constant dense<0.000000e+00> : vector<32x128xf32>
    %36 = tpu.matmul %35, %34, %cst_8 {dimension_numbers = #tpu.dot_dimension_numbers<[1], [0], [0], [1], [0, 0, 1, 1], [], []>} : vector<32x64xf32>, vector<64x128xf32>, vector<32x128xf32> -> vector<32x128xf32>
    %c0_9 = arith.constant 0 : index
    %c0_10 = arith.constant 0 : index
    %37 = vector.load %arg5[%c0_9, %c0_10] : memref<32x1xf32, #tpu.memory_space<vmem>>, vector<32x1xf32>
    %38 = vector.broadcast %37 : vector<32x1xf32> to vector<32x128xf32>
    %39 = arith.addf %36, %38 : vector<32x128xf32>
    %cst_11 = arith.constant 0.000000e+00 : f32
    %40 = vector.broadcast %cst_11 : f32 to vector<32x128xf32>
    %41 = arith.maximumf %39, %40 : vector<32x128xf32>
    %c0_12 = arith.constant 0 : index
    %c0_13 = arith.constant 0 : index
    %c0_14 = arith.constant 0 : index
    %42 = vector.load %arg6[%c0_12, %c0_13, %c0_14] : memref<3x32x1xf32, #tpu.memory_space<vmem>>, vector<1x32x1xf32>
    %43 = vector.shape_cast %42 : vector<1x32x1xf32> to vector<32x1xf32>
    %c0_15 = arith.constant 0 : index
    %c0_16 = arith.constant 0 : index
    %c0_17 = arith.constant 0 : index
    %44 = vector.load %arg7[%c0_15, %c0_16, %c0_17] : memref<3x32x1xf32, #tpu.memory_space<vmem>>, vector<1x32x1xf32>
    %45 = vector.shape_cast %44 : vector<1x32x1xf32> to vector<32x1xf32>
    %46 = vector.broadcast %43 : vector<32x1xf32> to vector<32x128xf32>
    %47 = arith.mulf %28, %46 : vector<32x128xf32>
    %cst_18 = arith.constant dense<0.000000e+00> : vector<128xf32>
    %48 = vector.multi_reduction <add>, %47, %cst_18 [0] : vector<32x128xf32> to vector<128xf32>
    %49 = vector.shape_cast %48 : vector<128xf32> to vector<1x128xf32>
    %50 = vector.broadcast %49 : vector<1x128xf32> to vector<32x128xf32>
    %51 = arith.mulf %28, %50 : vector<32x128xf32>
    %52 = vector.broadcast %45 : vector<32x1xf32> to vector<32x128xf32>
    %53 = arith.addf %51, %52 : vector<32x128xf32>
    %54 = arith.addf %53, %28 : vector<32x128xf32>
    %c1 = arith.constant 1 : index
    %c0_19 = arith.constant 0 : index
    %c0_20 = arith.constant 0 : index
    %55 = vector.load %arg6[%c1, %c0_19, %c0_20] : memref<3x32x1xf32, #tpu.memory_space<vmem>>, vector<1x32x1xf32>
    %56 = vector.shape_cast %55 : vector<1x32x1xf32> to vector<32x1xf32>
    %c1_21 = arith.constant 1 : index
    %c0_22 = arith.constant 0 : index
    %c0_23 = arith.constant 0 : index
    %57 = vector.load %arg7[%c1_21, %c0_22, %c0_23] : memref<3x32x1xf32, #tpu.memory_space<vmem>>, vector<1x32x1xf32>
    %58 = vector.shape_cast %57 : vector<1x32x1xf32> to vector<32x1xf32>
    %59 = vector.broadcast %56 : vector<32x1xf32> to vector<32x128xf32>
    %60 = arith.mulf %54, %59 : vector<32x128xf32>
    %cst_24 = arith.constant dense<0.000000e+00> : vector<128xf32>
    %61 = vector.multi_reduction <add>, %60, %cst_24 [0] : vector<32x128xf32> to vector<128xf32>
    %62 = vector.shape_cast %61 : vector<128xf32> to vector<1x128xf32>
    %63 = vector.broadcast %62 : vector<1x128xf32> to vector<32x128xf32>
    %64 = arith.mulf %28, %63 : vector<32x128xf32>
    %65 = vector.broadcast %58 : vector<32x1xf32> to vector<32x128xf32>
    %66 = arith.addf %64, %65 : vector<32x128xf32>
    %67 = arith.addf %66, %54 : vector<32x128xf32>
    %c2 = arith.constant 2 : index
    %c0_25 = arith.constant 0 : index
    %c0_26 = arith.constant 0 : index
    %68 = vector.load %arg6[%c2, %c0_25, %c0_26] : memref<3x32x1xf32, #tpu.memory_space<vmem>>, vector<1x32x1xf32>
    %69 = vector.shape_cast %68 : vector<1x32x1xf32> to vector<32x1xf32>
    %c2_27 = arith.constant 2 : index
    %c0_28 = arith.constant 0 : index
    %c0_29 = arith.constant 0 : index
    %70 = vector.load %arg7[%c2_27, %c0_28, %c0_29] : memref<3x32x1xf32, #tpu.memory_space<vmem>>, vector<1x32x1xf32>
    %71 = vector.shape_cast %70 : vector<1x32x1xf32> to vector<32x1xf32>
    %72 = vector.broadcast %69 : vector<32x1xf32> to vector<32x128xf32>
    %73 = arith.mulf %67, %72 : vector<32x128xf32>
    %cst_30 = arith.constant dense<0.000000e+00> : vector<128xf32>
    %74 = vector.multi_reduction <add>, %73, %cst_30 [0] : vector<32x128xf32> to vector<128xf32>
    %75 = vector.shape_cast %74 : vector<128xf32> to vector<1x128xf32>
    %76 = vector.broadcast %75 : vector<1x128xf32> to vector<32x128xf32>
    %77 = arith.mulf %28, %76 : vector<32x128xf32>
    %78 = vector.broadcast %71 : vector<32x1xf32> to vector<32x128xf32>
    %79 = arith.addf %77, %78 : vector<32x128xf32>
    %80 = arith.addf %79, %67 : vector<32x128xf32>
    %c0_31 = arith.constant 0 : index
    %c0_32 = arith.constant 0 : index
    %81 = vector.load %arg8[%c0_31, %c0_32] : memref<64x1xf32, #tpu.memory_space<vmem>>, vector<32x1xf32>
    %c32 = arith.constant 32 : index
    %c0_33 = arith.constant 0 : index
    %82 = vector.load %arg8[%c32, %c0_33] : memref<64x1xf32, #tpu.memory_space<vmem>>, vector<32x1xf32>
    %83 = vector.broadcast %81 : vector<32x1xf32> to vector<32x128xf32>
    %84 = arith.mulf %41, %83 : vector<32x128xf32>
    %cst_34 = arith.constant dense<0.000000e+00> : vector<128xf32>
    %85 = vector.multi_reduction <add>, %84, %cst_34 [0] : vector<32x128xf32> to vector<128xf32>
    %86 = vector.shape_cast %85 : vector<128xf32> to vector<1x128xf32>
    %87 = vector.broadcast %82 : vector<32x1xf32> to vector<32x128xf32>
    %88 = arith.mulf %80, %87 : vector<32x128xf32>
    %cst_35 = arith.constant dense<0.000000e+00> : vector<128xf32>
    %89 = vector.multi_reduction <add>, %88, %cst_35 [0] : vector<32x128xf32> to vector<128xf32>
    %90 = vector.shape_cast %89 : vector<128xf32> to vector<1x128xf32>
    %91 = arith.addf %86, %90 : vector<1x128xf32>
    %c0_36 = arith.constant 0 : index
    %c0_37 = arith.constant 0 : index
    %92 = memref.load %arg9[%c0_36, %c0_37] : memref<1x1xf32, #tpu.memory_space<smem>>
    %93 = vector.broadcast %92 : f32 to vector<1x128xf32>
    %94 = arith.addf %91, %93 : vector<1x128xf32>
    %c0_38 = arith.constant 0 : index
    %c0_39 = arith.constant 0 : index
    %95 = vector.load %arg10[%c0_38, %c0_39] : memref<1x128xf32, #tpu.memory_space<vmem>>, vector<1x128xf32>
    tpu.vector_store %arg10[%c0_38, %c0_39], %94 {strides = array<i32>} : memref<1x128xf32, #tpu.memory_space<vmem>>, vector<1x128xf32>,
    %96 = tpu.concatenate %28, %41, %80 in 0 : vector<32x128xf32>, vector<32x128xf32>, vector<32x128xf32> -> vector<96x128xf32>
    %97 = arith.truncf %96 : vector<96x128xf32> to vector<96x128xbf16>
    %c0_40 = arith.constant 0 : index
    %c0_41 = arith.constant 0 : index
    %98 = vector.load %arg11[%c0_40, %c0_41] : memref<96x128xbf16, #tpu.memory_space<vmem>>, vector<96x128xbf16>
    tpu.vector_store %arg11[%c0_40, %c0_41], %97 {strides = array<i32>} : memref<96x128xbf16, #tpu.memory_space<vmem>>, vector<96x128xbf16>,
    return
  }
  func.func @transform_0(%arg0: i32) -> (i32, i32) {
    %c0_i32 = arith.constant 0 : i32
    %c0_i32_0 = arith.constant 0 : i32
    return %c0_i32, %arg0 : i32, i32
  }
  func.func @transform_1(%arg0: i32) -> (i32, i32) {
    %c0_i32 = arith.constant 0 : i32
    %c0_i32_0 = arith.constant 0 : i32
    %c0_i32_1 = arith.constant 0 : i32
    return %c0_i32, %c0_i32_0 : i32, i32
  }
  func.func @transform_2(%arg0: i32) -> (i32, i32) {
    %c0_i32 = arith.constant 0 : i32
    %c0_i32_0 = arith.constant 0 : i32
    %c0_i32_1 = arith.constant 0 : i32
    return %c0_i32, %c0_i32_0 : i32, i32
  }
  func.func @transform_3(%arg0: i32) -> (i32, i32) {
    %c0_i32 = arith.constant 0 : i32
    %c0_i32_0 = arith.constant 0 : i32
    %c0_i32_1 = arith.constant 0 : i32
    return %c0_i32, %c0_i32_0 : i32, i32
  }
  func.func @transform_4(%arg0: i32) -> (i32, i32) {
    %c0_i32 = arith.constant 0 : i32
    %c0_i32_0 = arith.constant 0 : i32
    %c0_i32_1 = arith.constant 0 : i32
    return %c0_i32, %c0_i32_0 : i32, i32
  }
  func.func @transform_5(%arg0: i32) -> (i32, i32, i32) {
    %c0_i32 = arith.constant 0 : i32
    %c0_i32_0 = arith.constant 0 : i32
    %c0_i32_1 = arith.constant 0 : i32
    %c0_i32_2 = arith.constant 0 : i32
    return %c0_i32, %c0_i32_0, %c0_i32_1 : i32, i32, i32
  }
  func.func @transform_6(%arg0: i32) -> (i32, i32, i32) {
    %c0_i32 = arith.constant 0 : i32
    %c0_i32_0 = arith.constant 0 : i32
    %c0_i32_1 = arith.constant 0 : i32
    %c0_i32_2 = arith.constant 0 : i32
    return %c0_i32, %c0_i32_0, %c0_i32_1 : i32, i32, i32
  }
  func.func @transform_7(%arg0: i32) -> (i32, i32) {
    %c0_i32 = arith.constant 0 : i32
    %c0_i32_0 = arith.constant 0 : i32
    %c0_i32_1 = arith.constant 0 : i32
    return %c0_i32, %c0_i32_0 : i32, i32
  }
  func.func @transform_8(%arg0: i32) -> (i32, i32) {
    %c0_i32 = arith.constant 0 : i32
    %c0_i32_0 = arith.constant 0 : i32
    %c0_i32_1 = arith.constant 0 : i32
    return %c0_i32, %c0_i32_0 : i32, i32
  }
  func.func @transform_9(%arg0: i32) -> (i32, i32) {
    %c0_i32 = arith.constant 0 : i32
    %c0_i32_0 = arith.constant 0 : i32
    return %c0_i32, %arg0 : i32, i32
  }
  func.func @transform_10(%arg0: i32) -> (i32, i32) {
    %c0_i32 = arith.constant 0 : i32
    %c0_i32_0 = arith.constant 0 : i32
    return %c0_i32, %arg0 : i32, i32
  }
}

</mosaic_0001>

<bundles_post_ra>
// kernel: dcn_forward.1
= control target key start
LH: loop header
LB: loop body
LE: loop exit
PB: predicated region body
PF: predicated region fallthrough
CT: control target
= control target key end

     0   :  { %v36_v0 = vlaneseq  ;;  %v1643_v4 = vmov 0   ;;  %v1644_v27 = vmov 1.0|1.0   ;;  %s2337_s0 = inlined_call_operand.vmem [shape: s32[4,128], index: 0, kind: input, shape index: {}]   ;;  %s2338_s1 = inlined_call_operand.vmem [shape: f32[96,512], index: 1, kind: input, shape index: {}]   ;;  %s2339_s2 = inlined_call_operand.vmem [shape: f32[64,1], index: 2, kind: input, shape index: {}]   ;;  %s2340_s5 = inlined_call_operand.vmem [shape: f32[3,32,1], index: 5, kind: input, shape index: {}]   ;;  %s2341_s6 = inlined_call_operand.vmem [shape: f32[3,32,1], index: 6, kind: input, shape index: {}]   ;;  %s2342_s4 = inlined_call_operand.vmem [shape: f32[32,1], index: 4, kind: input, shape index: {}]   ;;  %s2343_s7 = inlined_call_operand.vmem [shape: f32[64,1], index: 7, kind: input, shape index: {}]   ;;  %s2344_s3 = inlined_call_operand.vmem [shape: f32[32,64], index: 3, kind: input, shape index: {}]   ;;  %s2345_s10 = inlined_call_operand.vmem [shape: bf16[96,128], index: 10, kind: output, shape index: {1}]   ;;  %s2346_s8 = inlined_call_operand.<no memory space> [shape: f32[1,1], index: 8, kind: input, shape index: {}]   ;;  %s2347_s9 = inlined_call_operand.vmem [shape: f32[1,128], index: 9, kind: output, shape index: {0}]  }
   0x1   :  { %v35_v1 = vld [vmem:[%s2337_s0] sm:$0xf]  ;;  %v313_v2 = vld [vmem:[%s2338_s1 + $0x8] sm:$0xff]  ;;  %v315_v3 = vld [vmem:[%s2338_s1 + $0x18] sm:$0xff]  ;;  %1641 = vset.pattern.permute.xlu0 %v1643_v4  ;;  %1642 = vset.pattern.permute.xlu1 %v1643_v4 }
   0x2   :  { %v1709_v5 = vshrl.u32 %v36_v0, 7  ;;  %v105_v6 = vadd.s32 128, %v35_v1  ;;  %424 = vmatprep.mubr.f32.mxu0 %v313_v2  ;;  %549 = vmatprep.mubr.f32.mxu1 %v315_v3  ;;  %v115_v7 = vadd.s32 384, %v35_v1  ;;  %v110_v8 = vadd.s32 256, %v35_v1  ;;  %v610_v31 = vld [vmem:[%s2339_s2] sm:$0xff]  ;;  %v611_v37 = vld [vmem:[%s2339_s2 + $0x8] sm:$0xff] }
   0x3   :  { %620 = vperm.xlu0 %1641, %v610_v31   ;;  %v614_v46 = vld [vmem:[%s2339_s2 + $0x20] sm:$0xff]  ;;  %v612_v47 = vld [vmem:[%s2339_s2 + $0x10] sm:$0xff]  ;;  %v613_v57 = vld [vmem:[%s2339_s2 + $0x18] sm:$0xff] }
   0x4   :  { %v53_v9 = vadd.s32 128, %v1709_v5  ;;  %v54_v10 = vadd.s32 136, %v1709_v5  ;;  %v108_v11 = vsub.s32 1, %v1709_v5  ;;  %v85_v12 = vadd.s32 384, %v1709_v5  ;;  %630 = vperm.xlu1 %1642, %v612_v47   ;;  %v616_v56 = vld [vmem:[%s2339_s2 + $0x30] sm:$0xff]  ;;  %v804_v3 = vld [vmem:[%s2340_s5] sm:$0xff] }
   0x5   :  { %v86_v13 = vadd.s32 392, %v1709_v5  ;;  %v118_v14 = vsub.s32 3, %v1709_v5  ;;  %v38_v15 = vadd.s32 8, %v1709_v5  ;;  %v103_v16 = vsub.s32 0, %v1709_v5  ;;  %v327_v47 = vld [vmem:[%s2338_s1 + $0x78] sm:$0xff] }
   0x6   :  { %v1719_v17 = vrot.slane %v105_v6, %v108_v11  ;;  %v69_v18 = vadd.s32 256, %v1709_v5  ;;  %v70_v19 = vadd.s32 264, %v1709_v5  ;;  %v113_v20 = vsub.s32 2, %v1709_v5 }
   0x7   :  { %v1724_v21 = vrot.slane %v115_v7, %v118_v14  ;;  %v1726_v22 = vrot.slane %v35_v1, %v103_v16  ;;  %v55_v23 = vadd.s32 144, %v1709_v5  ;;  %v56_v24 = vadd.s32 152, %v1709_v5  ;;  %625 = vperm.xlu0 %1641, %v611_v37   ;;  %v615_v1 = vld [vmem:[%s2339_s2 + $0x28] sm:$0xff]  ;;  %v806_v14 = vld [vmem:[%s2340_s5 + $0x10] sm:$0xff]  ;;  %v1306_v37 = vld [vmem:[%s2340_s5 + $0x20] sm:$0xff] }
   0x8   :  { %vm136_vm0 = vcmp.eq.s32.totalorder %v53_v9, %v1719_v17  ;;  %vm137_vm1 = vcmp.eq.s32.totalorder %v54_v10, %v1719_v17  ;;  %v1732_v25 = vrot.slane %v110_v8, %v113_v20  ;;  %v87_v26 = vadd.s32 400, %v1709_v5  ;;  %635 = vperm.xlu1 %1642, %v613_v57   ;;  %v330_v57 = vld [vmem:[%s2338_s1 + $0x90] sm:$0xff] }
   0x9   :  { %vm1551_vm2 = vmpackc.low %vm137_vm1, %vm136_vm0  ;;  %vm168_vm3 = vcmp.eq.s32.totalorder %v85_v12, %v1724_v21  ;;  %vm169_vm4 = vcmp.eq.s32.totalorder %v86_v13, %v1724_v21  ;;  %vm120_vm5 = vcmp.eq.s32.totalorder %v1709_v5, %v1726_v22  ;;  %vm121_vm6 = vcmp.eq.s32.totalorder %v38_v15, %v1726_v22  ;;  %v617_v12 = vld [vmem:[%s2339_s2 + $0x38] sm:$0xff] }
   0xa   :  { %1552 = vmatprep.subr.msk.bf16.mxu0 %vm1551_vm2, %v1644_v27  ;;  %vm1583_vm7 = vmpackc.low %vm169_vm4, %vm168_vm3  ;;  %vm152_vm8 = vcmp.eq.s32.totalorder %v69_v18, %v1732_v25  ;;  %vm153_vm9 = vcmp.eq.s32.totalorder %v70_v19, %v1732_v25  ;;  %vm138_vm10 = vcmp.eq.s32.totalorder %v55_v23, %v1719_v17  ;;  %vm139_vm11 = vcmp.eq.s32.totalorder %v56_v24, %v1719_v17 }
   0xb   :  { %1584 = vmatprep.subr.msk.bf16.mxu1 %vm1583_vm7, %v1644_v27  ;;  %vm1553_vm12 = vmpackc.low %vm121_vm6, %vm120_vm5  ;;  %v88_v28 = vadd.s32 408, %v1709_v5  ;;  %vm170_vm13 = vcmp.eq.s32.totalorder %v87_v26, %v1724_v21  ;;  %v39_v29 = vadd.s32 16, %v1709_v5  ;;  %v40_v30 = vadd.s32 24, %v1709_v5  ;;  %640 = vperm.xlu0 %1641, %v614_v46   ;;  %v805_v26 = vld [vmem:[%s2340_s5 + $0x8] sm:$0xff] }
   0xc   :  { %1554 = vmatpush3.bf16.msk.msra.mxu0 %vm1553_vm12, %v1644_v27  ;;  %vm1585_vm14 = vmpackc.low %vm153_vm9, %vm152_vm8  ;;  %v71_v32 = vadd.s32 272, %v1709_v5  ;;  %v72_v33 = vadd.s32 280, %v1709_v5  ;;  %v57_v34 = vadd.s32 160, %v1709_v5  ;;  %v58_v35 = vadd.s32 168, %v1709_v5  ;;  %645 = vperm.xlu1 %1642, %v615_v1   ;;  %v325_v46 = vld [vmem:[%s2338_s1 + $0x68] sm:$0xff]  ;;  %v339_v1 = vld [vmem:[%s2338_s1 + $0xd8] sm:$0xff] }
   0xd   :  { %1586 = vmatpush3.bf16.msk.msra.mxu1 %vm1585_vm14, %v1644_v27  ;;  %vm1555_vm15 = vmpackc.low %vm139_vm11, %vm138_vm10  ;;  %vm171_vm0 = vcmp.eq.s32.totalorder %v88_v28, %v1724_v21  ;;  %vm122_vm1 = vcmp.eq.s32.totalorder %v39_v29, %v1726_v22  ;;  %vm123_vm2 = vcmp.eq.s32.totalorder %v40_v30, %v1726_v22  ;;  %v89_v36 = vadd.s32 416, %v1709_v5  ;;  %v808_v29 = vld [vmem:[%s2341_s6] sm:$0xff] }
   0xe   :  { %1556 = vmatprep.subr.msk.bf16.mxu0 %vm1555_vm15, %v1644_v27  ;;  %vm1587_vm3 = vmpackc.low %vm171_vm0, %vm170_vm13  ;;  %vm154_vm4 = vcmp.eq.s32.totalorder %v71_v32, %v1732_v25  ;;  %vm155_vm5 = vcmp.eq.s32.totalorder %v72_v33, %v1732_v25  ;;  %vm140_vm6 = vcmp.eq.s32.totalorder %v57_v34, %v1719_v17  ;;  %vm141_vm7 = vcmp.eq.s32.totalorder %v58_v35, %v1719_v17  ;;  %v807_v35 = vld [vmem:[%s2340_s5 + $0x18] sm:$0xff] }
   0xf   :  { %1588 = vmatprep.subr.msk.bf16.mxu1 %vm1587_vm3, %v1644_v27  ;;  %vm1557_vm8 = vmpackc.low %vm123_vm2, %vm122_vm1  ;;  %v90_v38 = vadd.s32 424, %v1709_v5  ;;  %vm172_vm9 = vcmp.eq.s32.totalorder %v89_v36, %v1724_v21  ;;  %v41_v39 = vadd.s32 32, %v1709_v5  ;;  %v42_v40 = vadd.s32 40, %v1709_v5  ;;  %650 = vperm.xlu0 %1641, %v616_v56   ;;  %v319_v36 = vld [vmem:[%s2338_s1 + $0x38] sm:$0xff]  ;;  %v1311_v56 = vld [vmem:[%s2341_s6 + $0x28] sm:$0xff] }
  0x10   :  { %1558 = vmatpush3.bf16.msk.msra.mxu0 %vm1557_vm8, %v1644_v27  ;;  %vm1589_vm10 = vmpackc.low %vm155_vm5, %vm154_vm4  ;;  %v73_v41 = vadd.s32 288, %v1709_v5  ;;  %v74_v42 = vadd.s32 296, %v1709_v5  ;;  %v59_v43 = vadd.s32 176, %v1709_v5  ;;  %v60_v44 = vadd.s32 184, %v1709_v5  ;;  %655 = vperm.xlu1 %1642, %v617_v12   ;;  %v342_v12 = vld [vmem:[%s2338_s1 + $0xf0] sm:$0xff] }
  0x11   :  { %1590 = vmatpush3.bf16.msk.msra.mxu1 %vm1589_vm10, %v1644_v27  ;;  %vm1559_vm11 = vmpackc.low %vm141_vm7, %vm140_vm6  ;;  %vm173_vm12 = vcmp.eq.s32.totalorder %v90_v38, %v1724_v21  ;;  %vm124_vm13 = vcmp.eq.s32.totalorder %v41_v39, %v1726_v22  ;;  %vm125_vm14 = vcmp.eq.s32.totalorder %v42_v40, %v1726_v22  ;;  %v91_v45 = vadd.s32 432, %v1709_v5  ;;  %v811_v38 = vld [vmem:[%s2341_s6 + $0x18] sm:$0xff]  ;;  %v318_v39 = vld [vmem:[%s2338_s1 + $0x30] sm:$0xff] }
  0x12   :  { %1560 = vmatprep.subr.msk.bf16.mxu0 %vm1559_vm11, %v1644_v27  ;;  %vm1591_vm15 = vmpackc.low %vm173_vm12, %vm172_vm9  ;;  %vm156_vm0 = vcmp.eq.s32.totalorder %v73_v41, %v1732_v25  ;;  %vm157_vm1 = vcmp.eq.s32.totalorder %v74_v42, %v1732_v25  ;;  %vm142_vm2 = vcmp.eq.s32.totalorder %v59_v43, %v1719_v17  ;;  %vm143_vm3 = vcmp.eq.s32.totalorder %v60_v44, %v1719_v17  ;;  %v321_v40 = vld [vmem:[%s2338_s1 + $0x48] sm:$0xff]  ;;  %v323_v41 = vld [vmem:[%s2338_s1 + $0x58] sm:$0xff] }
  0x13   :  { %1592 = vmatprep.subr.msk.bf16.mxu1 %vm1591_vm15, %v1644_v27  ;;  %vm1561_vm4 = vmpackc.low %vm125_vm14, %vm124_vm13  ;;  %v92_v48 = vadd.s32 440, %v1709_v5  ;;  %vm174_vm5 = vcmp.eq.s32.totalorder %v91_v45, %v1724_v21  ;;  %v43_v49 = vadd.s32 48, %v1709_v5  ;;  %v44_v50 = vadd.s32 56, %v1709_v5  ;;  %814 = vperm.xlu0 %1641, %v804_v3   ;;  %v1308_v42 = vld [vmem:[%s2340_s5 + $0x30] sm:$0xff]  ;;  %v320_v43 = vld [vmem:[%s2338_s1 + $0x40] sm:$0xff] }
  0x14   :  { %1562 = vmatpush3.bf16.msk.msra.mxu0 %vm1561_vm4, %v1644_v27  ;;  %vm1593_vm6 = vmpackc.low %vm157_vm1, %vm156_vm0  ;;  %v75_v51 = vadd.s32 304, %v1709_v5  ;;  %v76_v52 = vadd.s32 312, %v1709_v5  ;;  %v61_v53 = vadd.s32 192, %v1709_v5  ;;  %v62_v54 = vadd.s32 200, %v1709_v5  ;;  %819 = vperm.xlu1 %1642, %v805_v26   ;;  %v1307_v44 = vld [vmem:[%s2340_s5 + $0x28] sm:$0xff]  ;;  %v322_v45 = vld [vmem:[%s2338_s1 + $0x50] sm:$0xff] }
  0x15   :  { %1594 = vmatpush3.bf16.msk.msra.mxu1 %vm1593_vm6, %v1644_v27  ;;  %vm1563_vm7 = vmpackc.low %vm143_vm3, %vm142_vm2  ;;  %vm175_vm8 = vcmp.eq.s32.totalorder %v92_v48, %v1724_v21  ;;  %vm126_vm9 = vcmp.eq.s32.totalorder %v43_v49, %v1726_v22  ;;  %vm127_vm10 = vcmp.eq.s32.totalorder %v44_v50, %v1726_v22  ;;  %v93_v55 = vadd.s32 448, %v1709_v5  ;;  %v1310_v48 = vld [vmem:[%s2341_s6 + $0x20] sm:$0xff]  ;;  %v1309_v50 = vld [vmem:[%s2340_s5 + $0x38] sm:$0xff] }
  0x16   :  { %1564 = vmatprep.subr.msk.bf16.mxu0 %vm1563_vm7, %v1644_v27  ;;  %vm1595_vm11 = vmpackc.low %vm175_vm8, %vm174_vm5  ;;  %vm158_vm12 = vcmp.eq.s32.totalorder %v75_v51, %v1732_v25  ;;  %vm159_vm13 = vcmp.eq.s32.totalorder %v76_v52, %v1732_v25  ;;  %vm144_vm14 = vcmp.eq.s32.totalorder %v61_v53, %v1719_v17  ;;  %vm145_vm15 = vcmp.eq.s32.totalorder %v62_v54, %v1719_v17  ;;  %v324_v49 = vld [vmem:[%s2338_s1 + $0x60] sm:$0xff]  ;;  %v326_v51 = vld [vmem:[%s2338_s1 + $0x70] sm:$0xff] }
  0x17   :  { %1596 = vmatprep.subr.msk.bf16.mxu1 %vm1595_vm11, %v1644_v27  ;;  %vm1565_vm0 = vmpackc.low %vm127_vm10, %vm126_vm9  ;;  %v94_v58 = vadd.s32 456, %v1709_v5  ;;  %vm176_vm1 = vcmp.eq.s32.totalorder %v93_v55, %v1724_v21  ;;  %v45_v59 = vadd.s32 64, %v1709_v5  ;;  %v46_v60 = vadd.s32 72, %v1709_v5  ;;  %824 = vperm.xlu0 %1641, %v806_v14   ;;  %v329_v52 = vld [vmem:[%s2338_s1 + $0x88] sm:$0xff]  ;;  %v331_v53 = vld [vmem:[%s2338_s1 + $0x98] sm:$0xff] }
  0x18   :  { %1566 = vmatpush3.bf16.msk.msra.mxu0 %vm1565_vm0, %v1644_v27  ;;  %vm1597_vm2 = vmpackc.low %vm159_vm13, %vm158_vm12  ;;  %v77_v61 = vadd.s32 320, %v1709_v5  ;;  %v78_v62 = vadd.s32 328, %v1709_v5  ;;  %v63_v63 = vadd.s32 208, %v1709_v5  ;;  %v64_v0 = vadd.s32 216, %v1709_v5  ;;  %829 = vperm.xlu1 %1642, %v807_v35   ;;  %v1312_v54 = vld [vmem:[%s2341_s6 + $0x30] sm:$0xff]  ;;  %v328_v55 = vld [vmem:[%s2338_s1 + $0x80] sm:$0xff] }
  0x19   :  { %1598 = vmatpush3.bf16.msk.msra.mxu1 %vm1597_vm2, %v1644_v27  ;;  %vm1567_vm3 = vmpackc.low %vm145_vm15, %vm144_vm14  ;;  %vm177_vm4 = vcmp.eq.s32.totalorder %v94_v58, %v1724_v21  ;;  %vm128_vm5 = vcmp.eq.s32.totalorder %v45_v59, %v1726_v22  ;;  %vm129_vm6 = vcmp.eq.s32.totalorder %v46_v60, %v1726_v22  ;;  %v95_v2 = vadd.s32 464, %v1709_v5  ;;  %v333_v58 = vld [vmem:[%s2338_s1 + $0xa8] sm:$0xff]  ;;  %v335_v59 = vld [vmem:[%s2338_s1 + $0xb8] sm:$0xff] }
  0x1a   :  { %1568 = vmatprep.subr.msk.bf16.mxu0 %vm1567_vm3, %v1644_v27  ;;  %vm1599_vm7 = vmpackc.low %vm177_vm4, %vm176_vm1  ;;  %vm160_vm8 = vcmp.eq.s32.totalorder %v77_v61, %v1732_v25  ;;  %vm161_vm9 = vcmp.eq.s32.totalorder %v78_v62, %v1732_v25  ;;  %vm146_vm10 = vcmp.eq.s32.totalorder %v63_v63, %v1719_v17  ;;  %vm147_vm11 = vcmp.eq.s32.totalorder %v64_v0, %v1719_v17  ;;  %v1314_v60 = vld [vmem:[%s2340_s5 + $0x40] sm:$0xff]  ;;  %v1313_v62 = vld [vmem:[%s2341_s6 + $0x38] sm:$0xff] }
  0x1b   :  { %1600 = vmatprep.subr.msk.bf16.mxu1 %vm1599_vm7, %v1644_v27  ;;  %vm1569_vm12 = vmpackc.low %vm129_vm6, %vm128_vm5  ;;  %v96_v4 = vadd.s32 472, %v1709_v5  ;;  %vm178_vm13 = vcmp.eq.s32.totalorder %v95_v2, %v1724_v21  ;;  %v47_v6 = vadd.s32 80, %v1709_v5  ;;  %v48_v7 = vadd.s32 88, %v1709_v5  ;;  %851 = vperm.xlu0 %1641, %v808_v29   ;;  %v332_v61 = vld [vmem:[%s2338_s1 + $0xa0] sm:$0xff]  ;;  %v334_v63 = vld [vmem:[%s2338_s1 + $0xb0] sm:$0xff] }
  0x1c   :  { %1570 = vmatpush3.bf16.msk.msra.mxu0 %vm1569_vm12, %v1644_v27  ;;  %vm1601_vm14 = vmpackc.low %vm161_vm9, %vm160_vm8  ;;  %v79_v8 = vadd.s32 336, %v1709_v5  ;;  %v80_v9 = vadd.s32 344, %v1709_v5  ;;  %v65_v10 = vadd.s32 224, %v1709_v5  ;;  %v66_v11 = vadd.s32 232, %v1709_v5  ;;  %v337_v0 = vld [vmem:[%s2338_s1 + $0xc8] sm:$0xff]  ;;  %v1316_v2 = vld [vmem:[%s2340_s5 + $0x50] sm:$0xff] }
  0x1d   :  { %1602 = vmatpush3.bf16.msk.msra.mxu1 %vm1601_vm14, %v1644_v27  ;;  %vm1571_vm15 = vmpackc.low %vm147_vm11, %vm146_vm10  ;;  %vm179_vm0 = vcmp.eq.s32.totalorder %v96_v4, %v1724_v21  ;;  %vm130_vm1 = vcmp.eq.s32.totalorder %v47_v6, %v1726_v22  ;;  %vm131_vm2 = vcmp.eq.s32.totalorder %v48_v7, %v1726_v22  ;;  %v97_v13 = vadd.s32 480, %v1709_v5  ;;  %v336_v3 = vld [vmem:[%s2338_s1 + $0xc0] sm:$0xff]  ;;  %v1315_v4 = vld [vmem:[%s2340_s5 + $0x48] sm:$0xff] }
  0x1e   :  { %1572 = vmatprep.subr.msk.bf16.mxu0 %vm1571_vm15, %v1644_v27  ;;  %vm1603_vm3 = vmpackc.low %vm179_vm0, %vm178_vm13  ;;  %vm162_vm4 = vcmp.eq.s32.totalorder %v79_v8, %v1732_v25  ;;  %vm163_vm5 = vcmp.eq.s32.totalorder %v80_v9, %v1732_v25  ;;  %vm148_vm6 = vcmp.eq.s32.totalorder %v65_v10, %v1719_v17  ;;  %vm149_vm7 = vcmp.eq.s32.totalorder %v66_v11, %v1719_v17  ;;  %v338_v6 = vld [vmem:[%s2338_s1 + $0xd0] sm:$0xff]  ;;  %v341_v7 = vld [vmem:[%s2338_s1 + $0xe8] sm:$0xff] }
  0x1f   :  { %1604 = vmatprep.subr.msk.bf16.mxu1 %vm1603_vm3, %v1644_v27  ;;  %vm1573_vm8 = vmpackc.low %vm131_vm2, %vm130_vm1  ;;  %v98_v15 = vadd.s32 488, %v1709_v5  ;;  %vm180_vm9 = vcmp.eq.s32.totalorder %v97_v13, %v1724_v21  ;;  %v49_v16 = vadd.s32 96, %v1709_v5  ;;  %v50_v18 = vadd.s32 104, %v1709_v5  ;;  %v343_v8 = vld [vmem:[%s2338_s1 + $0xf8] sm:$0xff]  ;;  %v678_v9 = vld [vmem:[%s2342_s4] sm:$0xff] }
  0x20   :  { %1574 = vmatpush3.bf16.msk.msra.mxu0 %vm1573_vm8, %v1644_v27  ;;  %vm1605_vm10 = vmpackc.low %vm163_vm5, %vm162_vm4  ;;  %v81_v19 = vadd.s32 352, %v1709_v5  ;;  %v82_v20 = vadd.s32 360, %v1709_v5  ;;  %v67_v23 = vadd.s32 240, %v1709_v5  ;;  %v68_v24 = vadd.s32 248, %v1709_v5  ;;  %v340_v10 = vld [vmem:[%s2338_s1 + $0xe0] sm:$0xff]  ;;  %v1317_v11 = vld [vmem:[%s2340_s5 + $0x58] sm:$0xff] }
  0x21   :  { %1606 = vmatpush3.bf16.msk.msra.mxu1 %vm1605_vm10, %v1644_v27  ;;  %vm1575_vm11 = vmpackc.low %vm149_vm7, %vm148_vm6  ;;  %vm181_vm12 = vcmp.eq.s32.totalorder %v98_v15, %v1724_v21  ;;  %vm132_vm13 = vcmp.eq.s32.totalorder %v49_v16, %v1726_v22  ;;  %vm133_vm14 = vcmp.eq.s32.totalorder %v50_v18, %v1726_v22  ;;  %v99_v28 = vadd.s32 496, %v1709_v5  ;;  %v345_v13 = vld [vmem:[%s2338_s1 + $0x108] sm:$0xff]  ;;  %v347_v14 = vld [vmem:[%s2338_s1 + $0x118] sm:$0xff] }
  0x22   :  { %1576 = vmatprep.subr.msk.bf16.mxu0 %vm1575_vm11, %v1644_v27  ;;  %vm1607_vm15 = vmpackc.low %vm181_vm12, %vm180_vm9  ;;  %vm164_vm0 = vcmp.eq.s32.totalorder %v81_v19, %v1732_v25  ;;  %vm165_vm1 = vcmp.eq.s32.totalorder %v82_v20, %v1732_v25  ;;  %vm150_vm2 = vcmp.eq.s32.totalorder %v67_v23, %v1719_v17  ;;  %vm151_vm3 = vcmp.eq.s32.totalorder %v68_v24, %v1719_v17  ;;  %v312_v17 = vld [vmem:[%s2338_s1] sm:$0xff]  ;;  %v679_v18 = vld [vmem:[%s2342_s4 + $0x8] sm:$0xff] }
  0x23   :  { %1608 = vmatprep.subr.msk.bf16.mxu1 %vm1607_vm15, %v1644_v27  ;;  %vm1577_vm4 = vmpackc.low %vm133_vm14, %vm132_vm13  ;;  %v100_v30 = vadd.s32 504, %v1709_v5  ;;  %vm182_vm5 = vcmp.eq.s32.totalorder %v99_v28, %v1724_v21  ;;  %v51_v31 = vadd.s32 112, %v1709_v5  ;;  %v52_v32 = vadd.s32 120, %v1709_v5  ;;  %v1318_v15 = vld [vmem:[%s2341_s6 + $0x40] sm:$0xff]  ;;  %v346_v19 = vld [vmem:[%s2338_s1 + $0x110] sm:$0xff] }
  0x24   :  { %1578 = vmatpush3.bf16.msk.msra.mxu0 %vm1577_vm4, %v1644_v27  ;;  %vm1609_vm6 = vmpackc.low %vm165_vm1, %vm164_vm0  ;;  %v83_v33 = vadd.s32 368, %v1709_v5  ;;  %v84_v34 = vadd.s32 376, %v1709_v5  ;;  %v810_v5 = vld [vmem:[%s2341_s6 + $0x10] sm:$0xff]  ;;  %v344_v16 = vld [vmem:[%s2338_s1 + $0x100] sm:$0xff]  ;;  %vm702_vm0 = vcmask 523264  }
  0x25   :  { %1610 = vmatpush3.bf16.msk.msra.mxu1 %vm1609_vm6, %v1644_v27  ;;  %vm1579_vm7 = vmpackc.low %vm151_vm3, %vm150_vm2  ;;  %vm183_vm8 = vcmp.eq.s32.totalorder %v100_v30, %v1724_v21  ;;  %vm134_vm9 = vcmp.eq.s32.totalorder %v51_v31, %v1726_v22  ;;  %vm135_vm10 = vcmp.eq.s32.totalorder %v52_v32, %v1726_v22  ;;  %861 = vperm.xlu0 %1641, %v810_v5   ;;  %v809_v21 = vld [vmem:[%s2341_s6 + $0x8] sm:$0xff]  ;;  %v314_v22 = vld [vmem:[%s2338_s1 + $0x10] sm:$0xff] }
  0x26   :  { %1580 = vmatprep.subr.msk.bf16.mxu0 %vm1579_vm7, %v1644_v27  ;;  %vm1611_vm11 = vmpackc.low %vm183_vm8, %vm182_vm5  ;;  %vm166_vm12 = vcmp.eq.s32.totalorder %v83_v33, %v1732_v25  ;;  %vm167_vm13 = vcmp.eq.s32.totalorder %v84_v34, %v1732_v25  ;;  %v317_v25 = vld [vmem:[%s2338_s1 + $0x28] sm:$0xff]  ;;  %856 = vperm.xlu1 %1642, %v809_v21   ;;  %v351_v23 = vld [vmem:[%s2338_s1 + $0x138] sm:$0xff] }
  0x27   :  { %1612 = vmatprep.subr.msk.bf16.mxu1 %vm1611_vm11, %v1644_v27  ;;  %vm1581_vm14 = vmpackc.low %vm135_vm10, %vm134_vm9  ;;  %v349_v20 = vld [vmem:[%s2338_s1 + $0x128] sm:$0xff]  ;;  %v680_v24 = vld [vmem:[%s2342_s4 + $0x10] sm:$0xff] }
  0x28   :  { %1582 = vmatpush3.bf16.msk.msra.mxu0 %vm1581_vm14, %v1644_v27  ;;  %vm1613_vm15 = vmpackc.low %vm167_vm13, %vm166_vm12  ;;  %v348_v26 = vld [vmem:[%s2338_s1 + $0x120] sm:$0xff]  ;;  %v1319_v28 = vld [vmem:[%s2341_s6 + $0x48] sm:$0xff] }
  0x29   :  { %1614 = vmatpush3.bf16.msk.msra.mxu1 %vm1613_vm15, %v1644_v27  ;;  %v316_v27 = vld [vmem:[%s2338_s1 + $0x20] sm:$0xff]  ;;  %889 = vperm.xlu0 %1641, %v1306_v37   ;;  %v350_v29 = vld [vmem:[%s2338_s1 + $0x130] sm:$0xff]  ;;  %v353_v30 = vld [vmem:[%s2338_s1 + $0x148] sm:$0xff] }
  0x2a   :  { %866 = vperm.xlu1 %1642, %v811_v38   ;;  %v355_v31 = vld [vmem:[%s2338_s1 + $0x158] sm:$0xff]  ;;  %v352_v33 = vld [vmem:[%s2338_s1 + $0x140] sm:$0xff]  ;;  %v1320_v34 = vld [vmem:[%s2341_s6 + $0x50] sm:$0xff] }
  0x2b   :  { %425 = vmatmul.mubr.f32.vlgmr.msra.gmra.mrb[0].mxu0 %v312_v17  ;;  %v681_v32 = vld [vmem:[%s2342_s4 + $0x18] sm:$0xff]  ;;  %v354_v35 = vld [vmem:[%s2338_s1 + $0x150] sm:$0xff]  ;;  %v357_v5 = vld [vmem:[%s2338_s1 + $0x168] sm:$0xff] }
  0x2c   :  { %550 = vmatmul.mubr.f32.vlgmr.msra.gmra.mrb[0].mxu1 %v314_v22  ;;  %429 = vmatprep.mubr.f32.mxu0 %v317_v25  ;;  %v359_v17 = vld [vmem:[%s2338_s1 + $0x178] sm:$0xff]  ;;  %v1027_v21 = vld [vmem:[%s2343_s7] sm:$0xff]  ;;  %v1029_v38 = vld [vmem:[%s2343_s7 + $0x10] sm:$0xff] }
  0x2d   :  { %554 = vmatprep.mubr.f32.mxu1 %v319_v36  ;;  %899 = vperm.xlu0 %1641, %v1308_v42   ;;  %v356_v22 = vld [vmem:[%s2338_s1 + $0x160] sm:$0xff]  ;;  %v1321_v25 = vld [vmem:[%s2341_s6 + $0x58] sm:$0xff]  ;;  %v358_v36 = vld [vmem:[%s2338_s1 + $0x170] sm:$0xff] }
  0x2e   :  { %894 = vperm.xlu1 %1642, %v1307_v44   ;;  %v1031_v37 = vld [vmem:[%s2343_s7 + $0x20] sm:$0xff]  ;;  %v1034_v42 = vld [vmem:[%s2343_s7 + $0x38] sm:$0xff]  ;;  %v676_v44 = vld [vmem:[%s2344_s3 + $0x10] sm:$0xff] }
  0x2f   :  { %430 = vmatmul.mubr.f32.gmra.mrb[2].mxu0 %v316_v27  ;;  %v1028_v27 = vld [vmem:[%s2343_s7 + $0x8] sm:$0xff] }
  0x30   :  { %555 = vmatmul.mubr.f32.gmra.mrb[2].mxu1 %v318_v39  ;;  %434 = vmatprep.mubr.f32.mxu0 %v321_v40  ;;  %v1032_v39 = vld [vmem:[%s2343_s7 + $0x28] sm:$0xff]  ;;  %v1030_v40 = vld [vmem:[%s2343_s7 + $0x18] sm:$0xff] }
  0x31   :  { %559 = vmatprep.mubr.f32.mxu1 %v323_v41  ;;  %926 = vperm.xlu0 %1641, %v1310_v48   ;;  %v1033_v41 = vld [vmem:[%s2343_s7 + $0x30] sm:$0xff] }
  0x32   :  { %904 = vperm.xlu1 %1642, %v1309_v50  }
  0x33   :  { %435 = vmatmul.mubr.f32.gmra.mrb[4].mxu0 %v320_v43  ;;  %v674_v43 = vld [vmem:[%s2344_s3] sm:$0xff] }
  0x34   :  { %560 = vmatmul.mubr.f32.gmra.mrb[4].mxu1 %v322_v45  ;;  %439 = vmatprep.mubr.f32.mxu0 %v325_v46 }
  0x35   :  { %564 = vmatprep.mubr.f32.mxu1 %v327_v47  ;;  %936 = vperm.xlu0 %1641, %v1312_v54  }
  0x36   :  { %931 = vperm.xlu1 %1642, %v1311_v56  }
  0x37   :  { %440 = vmatmul.mubr.f32.gmra.mrb[6].mxu0 %v324_v49 }
  0x38   :  { %565 = vmatmul.mubr.f32.gmra.mrb[6].mxu1 %v326_v51  ;;  %444 = vmatprep.mubr.f32.mxu0 %v329_v52 }
  0x39   :  { %569 = vmatprep.mubr.f32.mxu1 %v331_v53  ;;  %964 = vperm.xlu0 %1641, %v1314_v60  }
  0x3a   :  { %941 = vperm.xlu1 %1642, %v1313_v62  }
  0x3b   :  { %445 = vmatmul.mubr.f32.gmra.mrb[8].mxu0 %v328_v55 }
  0x3c   :  { %570 = vmatmul.mubr.f32.gmra.mrb[8].mxu1 %v330_v57  ;;  %449 = vmatprep.mubr.f32.mxu0 %v333_v58 }
  0x3d   :  { %574 = vmatprep.mubr.f32.mxu1 %v335_v59  ;;  %974 = vperm.xlu0 %1641, %v1316_v2  }
  0x3e   :  { %969 = vperm.xlu1 %1642, %v1315_v4  }
  0x3f   :  { %450 = vmatmul.mubr.f32.gmra.mrb[10].mxu0 %v332_v61 }
  0x40   :  { %575 = vmatmul.mubr.f32.gmra.mrb[10].mxu1 %v334_v63  ;;  %454 = vmatprep.mubr.f32.mxu0 %v337_v0 }
  0x41   :  { %579 = vmatprep.mubr.f32.mxu1 %v339_v1  ;;  %684 = vperm.xlu0 %1641, %v678_v9  }
  0x42   :  { %979 = vperm.xlu1 %1642, %v1317_v11  }
  0x43   :  { %455 = vmatmul.mubr.f32.gmra.mrb[12].mxu0 %v336_v3 }
  0x44   :  { %580 = vmatmul.mubr.f32.gmra.mrb[12].mxu1 %v338_v6  ;;  %459 = vmatprep.mubr.f32.mxu0 %v341_v7 }
  0x45   :  { %584 = vmatprep.mubr.f32.mxu1 %v343_v8  ;;  %1001 = vperm.xlu0 %1641, %v1318_v15  }
  0x46   :  { %689 = vperm.xlu1 %1642, %v679_v18  }
  0x47   :  { %460 = vmatmul.mubr.f32.gmra.mrb[14].mxu0 %v340_v10 }
  0x48   :  { %585 = vmatmul.mubr.f32.gmra.mrb[14].mxu1 %v342_v12  ;;  %464 = vmatprep.mubr.f32.mxu0 %v345_v13 }
  0x49   :  { %589 = vmatprep.mubr.f32.mxu1 %v347_v14  ;;  %694 = vperm.xlu0 %1641, %v680_v24  }
  0x4a   :  { %1006 = vperm.xlu1 %1642, %v1319_v28  }
  0x4b   :  { %465 = vmatmul.mubr.f32.gmra.mrb[16].mxu0 %v344_v16 }
  0x4c   :  { %590 = vmatmul.mubr.f32.gmra.mrb[16].mxu1 %v346_v19  ;;  %469 = vmatprep.mubr.f32.mxu0 %v349_v20 }
  0x4d   :  { %594 = vmatprep.mubr.f32.mxu1 %v351_v23  ;;  %699 = vperm.xlu0 %1641, %v681_v32  }
  0x4e   :  { %1011 = vperm.xlu1 %1642, %v1320_v34  }
  0x4f   :  { %470 = vmatmul.mubr.f32.gmra.mrb[18].mxu0 %v348_v26 }
  0x50   :  { %595 = vmatmul.mubr.f32.gmra.mrb[18].mxu1 %v350_v29  ;;  %474 = vmatprep.mubr.f32.mxu0 %v353_v30 }
  0x51   :  { %599 = vmatprep.mubr.f32.mxu1 %v355_v31  ;;  %1037 = vperm.xlu0 %1641, %v1027_v21  }
  0x52   :  { %1016 = vperm.xlu1 %1642, %v1321_v25  }
  0x53   :  { %475 = vmatmul.mubr.f32.gmra.mrb[20].mxu0 %v352_v33 }
  0x54   :  { %600 = vmatmul.mubr.f32.gmra.mrb[20].mxu1 %v354_v35  ;;  %479 = vmatprep.mubr.f32.mxu0 %v357_v5 }
  0x55   :  { %604 = vmatprep.mubr.f32.mxu1 %v359_v17  ;;  %1070 = vperm.xlu0 %1641, %v1031_v37  }
  0x56   :  { %1042 = vperm.xlu1 %1642, %v1028_v27  }
  0x57   :  { %480 = vmatmul.mubr.f32.gmra.mrb[22].mxu0 %v356_v22 }
  0x58   :  { %605 = vmatmul.mubr.f32.gmra.mrb[22].mxu1 %v358_v36  ;;  %1545 = vmatprep.mubr.msk.f32.mxu0 %vm702_vm0, %v674_v43 }
  0x59   :  { %1047 = vperm.xlu0 %1641, %v1029_v38   ;;  %1548 = vmatprep.mubr.msk.f32.mxu1 %vm702_vm0, %v676_v44 }
  0x5a   :  { %1075 = vperm.xlu1 %1642, %v1032_v39  }
  0x5d   :  { %1052 = vperm.xlu0 %1641, %v1030_v40  }
  0x5e   :  { %1080 = vperm.xlu1 %1642, %v1033_v41  }
  0x62   :  { %1085 = vperm.xlu1 %1642, %v1034_v42  }
  0x82   :  { %v2207_v47 = vpop.permute.xlu0 %620 }
  0x83   :  { %v2203_v45 = vpop.permute.xlu1 %630 }
  0x86   :  { %v2211_v49 = vpop.permute.xlu0 %625 }
  0x87   :  { %v2205_v46 = vpop.permute.xlu1 %635 }
  0x8a   :  { %v2215_v51 = vpop.permute.xlu0 %640 }
  0x8b   :  { %v2209_v48 = vpop.permute.xlu1 %645 }
  0x8e   :  { %v2217_v53 = vpop.permute.xlu0 %650 }
  0x8f   :  { %v2213_v50 = vpop.permute.xlu1 %655 }
  0x92   :  { %v815_v58 = vpop.permute.xlu0 %814 }
  0x93   :  { %v820_v52 = vpop.permute.xlu1 %819 }
  0x96   :  { %v825_v7 = vpop.permute.xlu0 %824 }
  0x97   :  { %v830_v54 = vpop.permute.xlu1 %829 }
  0x9a   :  { %v2235_v26 = vpop.permute.xlu0 %851 }
  0xa4   :  { %v862_v39 = vpop.permute.xlu0 %861 }
  0xa5   :  { %v2221_v2 = vpop.permute.xlu1 %856 }
  0xa9   :  { %v2227_v16 = vpop.permute.xlu1 %866 }
  0xad   :  { %v2241_v21 = vpop.permute.xlu1 %894 }
  0xfe   :  { %v1413_v55 = vpop.f32.mrb[0].mxu0 }
  0xff   :  { %v1481_v56 = vpop.f32.mrb[0].mxu1  ;;  %v1414_v57 = vpop.f32.mrb[1].mxu0 }
 0x100   :  { %v1415_v59 = vadd.f32 %v1414_v57, %v1413_v55  ;;  %v1482_v60 = vpop.f32.mrb[1].mxu1 }
 0x101   :  { %v1483_v61 = vadd.f32 %v1482_v60, %v1481_v56 }
 0x102   :  { %v1416_v62 = vpop.f32.mrb[2].mxu0 }
 0x103   :  { %v2219_v63 = vadd.f32 %v1483_v61, %v1415_v59  ;;  %v1484_v0 = vpop.f32.mrb[2].mxu1  ;;  %v1417_v1 = vpop.f32.mrb[3].mxu0 }
 0x104   :  { %v1418_v3 = vadd.f32 %v1417_v1, %v1416_v62  ;;  %v1485_v4 = vpop.f32.mrb[3].mxu1  ;;  %v890_v1 = vpop.permute.xlu0 %889 }
 0x105   :  { %v1486_v6 = vadd.f32 %v1485_v4, %v1484_v0  ;;  %v832_v30 = vmul.f32 %v815_v58, %v2219_v63  ;;  %v2249_v58 = vpop.permute.xlu1 %904 }
 0x106   :  { %v1419_v8 = vpop.f32.mrb[4].mxu0 }
 0x107   :  { %v2223_v9 = vadd.f32 %v1486_v6, %v1418_v3  ;;  %v1487_v10 = vpop.f32.mrb[4].mxu1  ;;  %v1420_v11 = vpop.f32.mrb[5].mxu0 }
 0x108   :  { %v1421_v12 = vadd.f32 %v1420_v11, %v1419_v8  ;;  %v1488_v13 = vpop.f32.mrb[5].mxu1 }
 0x109   :  { %v1349_v14 = vpack.c.bf16 %v2223_v9, %v2219_v63  ;;  %v1489_v15 = vadd.f32 %v1488_v13, %v1487_v10  ;;  %v833_v19 = vmul.f32 %v820_v52, %v2223_v9 }
 0x10a   :  { %v1422_v18 = vpop.f32.mrb[6].mxu0 }
 0x10b   :  { %v2230_v20 = vadd.f32 %v1489_v15, %v1421_v12  ;;  %v1490_v23 = vpop.f32.mrb[6].mxu1  ;;  %v1423_v24 = vpop.f32.mrb[7].mxu0  ;;  %1350 = vst [vmem:[%s2345_s10] sm:$0xff] %v1349_v14   ;;  %v836_v34 = vadd.f32 %v833_v19, %v832_v30 }
 0x10c   :  { %v1424_v28 = vadd.f32 %v1423_v24, %v1422_v18  ;;  %v1491_v29 = vpop.f32.mrb[7].mxu1  ;;  %v2253_v19 = vpop.permute.xlu1 %931 }
 0x10d   :  { %v834_v31 = vmul.f32 %v825_v7, %v2230_v20  ;;  %v1492_v32 = vadd.f32 %v1491_v29, %v1490_v23  ;;  %v900_v30 = vpop.permute.xlu0 %899 }
 0x10e   :  { %v1425_v33 = vpop.f32.mrb[8].mxu0 }
 0x10f   :  { %v2239_v35 = vadd.f32 %v1492_v32, %v1424_v28  ;;  %v1493_v5 = vpop.f32.mrb[8].mxu1  ;;  %v1426_v17 = vpop.f32.mrb[9].mxu0  ;;  %v837_v36 = vadd.f32 %v836_v34, %v834_v31 }
 0x110   :  { %v1427_v22 = vadd.f32 %v1426_v17, %v1425_v33  ;;  %v1494_v25 = vpop.f32.mrb[9].mxu1 }
 0x111   :  { %v835_v37 = vmul.f32 %v830_v54, %v2239_v35  ;;  %v1354_v27 = vpack.c.bf16 %v2239_v35, %v2230_v20  ;;  %v1495_v38 = vadd.f32 %v1494_v25, %v1493_v5 }
 0x112   :  { %v1428_v40 = vpop.f32.mrb[10].mxu0 }
 0x113   :  { %v838_v41 = vadd.f32 %v837_v36, %v835_v37  ;;  %v572_v42 = vadd.f32 %v1495_v38, %v1427_v22  ;;  %v1496_v43 = vpop.f32.mrb[10].mxu1  ;;  %v1429_v44 = vpop.f32.mrb[11].mxu0  ;;  %1376 = vst [vmem:[%s2345_s10 + $0x8] sm:$0xff] %v1354_v27  }
 0x114   :  { %v1430_v52 = vadd.f32 %v1429_v44, %v1428_v40  ;;  %v1497_v55 = vpop.f32.mrb[11].mxu1  ;;  %v2260_v38 = vpop.permute.xlu1 %941 }
 0x115   :  { %v839_v56 = vrot.slane %v838_v41, 4  ;;  %v1498_v57 = vadd.f32 %v1497_v55, %v1496_v43  ;;  %v658_v60 = vadd.f32 %v2207_v47, %v572_v42 }
 0x116   :  { %v1431_v54 = vpop.f32.mrb[12].mxu0 }
 0x117   :  { %v840_v59 = vadd.f32 %v839_v56, %v838_v41  ;;  %v577_v61 = vadd.f32 %v1498_v57, %v1430_v52  ;;  %v1499_v62 = vpop.f32.mrb[12].mxu1  ;;  %v1432_v0 = vpop.f32.mrb[13].mxu0  ;;  %v666_v12 = vmax.f32 %v658_v60, 0.0 }
 0x118   :  { %v1433_v3 = vadd.f32 %v1432_v0, %v1431_v54  ;;  %v1500_v4 = vpop.f32.mrb[13].mxu1  ;;  %v2266_v57 = vpop.permute.xlu0 %926 }
 0x119   :  { %v841_v6 = vrot.slane %v840_v59, 2  ;;  %v659_v7 = vadd.f32 %v2211_v49, %v577_v61  ;;  %v1501_v8 = vadd.f32 %v1500_v4, %v1499_v62 }
 0x11a   :  { %v1434_v10 = vpop.f32.mrb[14].mxu0 }
 0x11b   :  { %v842_v11 = vadd.f32 %v841_v6, %v840_v59  ;;  %v667_v13 = vmax.f32 %v659_v7, 0.0  ;;  %v582_v14 = vadd.f32 %v1501_v8, %v1433_v3  ;;  %v1502_v15 = vpop.f32.mrb[14].mxu1  ;;  %v1435_v18 = vpop.f32.mrb[15].mxu0 }
 0x11c   :  { %v1436_v47 = vadd.f32 %v1435_v18, %v1434_v10  ;;  %v1503_v23 = vpop.f32.mrb[15].mxu1  ;;  %v2283_v10 = vpop.permute.xlu1 %969 }
 0x11d   :  { %v843_v24 = vrot.slane %v842_v11, 1  ;;  %v1615_v28 = vpack.c.bf16 %v667_v13, %v666_v12  ;;  %v1504_v29 = vadd.f32 %v1503_v23, %v1502_v15  ;;  %v660_v5 = vadd.f32 %v2203_v45, %v582_v14 }
 0x11e   :  { %v1437_v31 = vpop.f32.mrb[16].mxu0 }
 0x11f   :  { %v844_v32 = vadd.f32 %v843_v24, %v842_v11  ;;  %v587_v33 = vadd.f32 %v1504_v29, %v1436_v47  ;;  %v1505_v49 = vpop.f32.mrb[16].mxu1  ;;  %1616 = vmatprep.subr.bf16.mxu0 %v1615_v28  ;;  %1631 = vmatprep.subr.bf16.mxu1 %v1615_v28  ;;  %v1438_v34 = vpop.f32.mrb[17].mxu0  ;;  %v668_v54 = vmax.f32 %v660_v5, 0.0 }
 0x120   :  { %v1439_v17 = vadd.f32 %v1438_v34, %v1437_v31  ;;  %v1506_v22 = vpop.f32.mrb[17].mxu1  ;;  %1618 = vmatpush3.bf16.msra.mxu0 %v1615_v28  ;;  %1635 = vmatpush3.bf16.msra.mxu1 %v1615_v28 }
 0x121   :  { %v848_v25 = vmul.f32 %v844_v32, %v2239_v35  ;;  %v845_v36 = vmul.f32 %v844_v32, %v2219_v63  ;;  %v846_v37 = vmul.f32 %v844_v32, %v2223_v9  ;;  %v847_v27 = vmul.f32 %v844_v32, %v2230_v20 }
 0x122   :  { %v661_v40 = vadd.f32 %v2205_v46, %v587_v33  ;;  %v1507_v41 = vadd.f32 %v1506_v22, %v1505_v49  ;;  %v1440_v42 = vpop.f32.mrb[18].mxu0 }
 0x123   :  { %v872_v45 = vadd.f32 %v2227_v16, %v848_v25  ;;  %v869_v43 = vadd.f32 %v2235_v26, %v845_v36  ;;  %v870_v44 = vadd.f32 %v2221_v2, %v846_v37  ;;  %v871_v52 = vadd.f32 %v862_v39, %v847_v27  ;;  %v1508_v55 = vpop.f32.mrb[18].mxu1  ;;  %v1441_v56 = vpop.f32.mrb[19].mxu0 }
 0x124   :  { %v669_v59 = vmax.f32 %v661_v40, 0.0  ;;  %v592_v60 = vadd.f32 %v1507_v41, %v1439_v17  ;;  %v1442_v61 = vadd.f32 %v1441_v56, %v1440_v42  ;;  %v1509_v62 = vpop.f32.mrb[19].mxu1  ;;  %v980_v17 = vpop.permute.xlu1 %979  ;;  %v677_v56 = vld [vmem:[%s2344_s3 + $0x18] sm:$0xff] }
 0x125   :  { %v2269_v46 = vadd.f32 %v869_v43, %v2219_v63  ;;  %v2272_v0 = vadd.f32 %v870_v44, %v2223_v9  ;;  %v2275_v16 = vadd.f32 %v871_v52, %v2230_v20  ;;  %v1510_v26 = vadd.f32 %v1509_v62, %v1508_v55 }
 0x126   :  { %v1619_v2 = vpack.c.bf16 %v669_v59, %v668_v54  ;;  %v1443_v39 = vpop.f32.mrb[20].mxu0  ;;  %v2278_v3 = vadd.f32 %v872_v45, %v2239_v35  ;;  %v662_v11 = vadd.f32 %v2215_v51, %v592_v60 }
 0x127   :  { %v907_v4 = vmul.f32 %v890_v1, %v2269_v46  ;;  %v908_v6 = vmul.f32 %v2241_v21, %v2272_v0  ;;  %v1511_v7 = vpop.f32.mrb[20].mxu1  ;;  %v1444_v8 = vpop.f32.mrb[21].mxu0  ;;  %v597_v12 = vadd.f32 %v1510_v26, %v1442_v61  ;;  %v909_v15 = vmul.f32 %v900_v30, %v2275_v16 }
 0x128   :  { %1620 = vmatprep.subr.bf16.mxu0 %v1619_v2  ;;  %1632 = vmatprep.subr.bf16.mxu1 %v1619_v2  ;;  %v1445_v13 = vadd.f32 %v1444_v8, %v1443_v39  ;;  %v1512_v14 = vpop.f32.mrb[21].mxu1  ;;  %v937_v1 = vpop.permute.xlu0 %936  ;;  %v910_v24 = vmul.f32 %v2249_v58, %v2278_v3  ;;  %v670_v32 = vmax.f32 %v662_v11, 0.0 }
 0x129   :  { %v911_v18 = vadd.f32 %v908_v6, %v907_v4  ;;  %v1513_v47 = vadd.f32 %v1512_v14, %v1511_v7  ;;  %1622 = vmatpush3.bf16.msra.mxu0 %v1619_v2  ;;  %1636 = vmatpush3.bf16.msra.mxu1 %v1619_v2  ;;  %v663_v21 = vadd.f32 %v2209_v48, %v597_v12  ;;  %v2292_v45 = vpop.permute.xlu1 %689 }
 0x12a   :  { %v1446_v23 = vpop.f32.mrb[22].mxu0 }
 0x12b   :  { %v912_v28 = vadd.f32 %v911_v18, %v909_v15  ;;  %v602_v51 = vadd.f32 %v1513_v47, %v1445_v13  ;;  %v1514_v29 = vpop.f32.mrb[22].mxu1  ;;  %v1447_v31 = vpop.f32.mrb[23].mxu0  ;;  %v671_v33 = vmax.f32 %v663_v21, 0.0 }
 0x12c   :  { %v1448_v49 = vadd.f32 %v1447_v31, %v1446_v23  ;;  %v1515_v34 = vpop.f32.mrb[23].mxu1  ;;  %v965_v37 = vpop.permute.xlu0 %964 }
 0x12d   :  { %v913_v30 = vadd.f32 %v912_v28, %v910_v24  ;;  %v1516_v5 = vadd.f32 %v1515_v34, %v1514_v29  ;;  %v1623_v22 = vpack.c.bf16 %v671_v33, %v670_v32  ;;  %v664_v36 = vadd.f32 %v2217_v53, %v602_v51  ;;  %v675_v53 = vld [vmem:[%s2344_s3 + $0x8] sm:$0xff]  ;;  %v1007_v54 = vpop.permute.xlu1 %1006 }
 0x12f   :  { %v914_v25 = vrot.slane %v913_v30, 4  ;;  %v607_v48 = vadd.f32 %v1516_v5, %v1448_v49  ;;  %1624 = vmatprep.subr.bf16.mxu0 %v1623_v22  ;;  %1633 = vmatprep.subr.bf16.mxu1 %v1623_v22  ;;  %v672_v41 = vmax.f32 %v664_v36, 0.0 }
 0x130   :  { %1626 = vmatpush3.bf16.msra.mxu0 %v1623_v22  ;;  %1637 = vmatpush3.bf16.msra.mxu1 %v1623_v22  ;;  %v975_v52 = vpop.permute.xlu0 %974 }
 0x131   :  { %v915_v58 = vadd.f32 %v914_v25, %v913_v30  ;;  %v665_v27 = vadd.f32 %v2213_v50, %v607_v48  ;;  %v1012_v12 = vpop.permute.xlu1 %1011 }
 0x133   :  { %v916_v40 = vrot.slane %v915_v58, 2  ;;  %v673_v42 = vmax.f32 %v665_v27, 0.0 }
 0x134   :  { %v685_v2 = vpop.permute.xlu0 %684 }
 0x135   :  { %v917_v43 = vadd.f32 %v916_v40, %v915_v58  ;;  %v1627_v44 = vpack.c.bf16 %v673_v42, %v672_v41 }
 0x137   :  { %v918_v55 = vrot.slane %v917_v43, 1  ;;  %1628 = vmatprep.subr.bf16.mxu0 %v1627_v44  ;;  %1634 = vmatprep.subr.bf16.mxu1 %v1627_v44 }
 0x138   :  { %1630 = vmatpush3.bf16.msra.mxu0 %v1627_v44  ;;  %1638 = vmatpush3.bf16.msra.mxu1 %v1627_v44  ;;  %v1002_v18 = vpop.permute.xlu0 %1001 }
 0x139   :  { %v919_v50 = vadd.f32 %v918_v55, %v917_v43 }
 0x13b   :  { %v920_v59 = vmul.f32 %v919_v50, %v2219_v63  ;;  %v921_v60 = vmul.f32 %v919_v50, %v2223_v9  ;;  %v922_v61 = vmul.f32 %v919_v50, %v2230_v20  ;;  %v923_v62 = vmul.f32 %v919_v50, %v2239_v35  ;;  %1546 = vmatmul.mubr.msk.f32.vlgmr.msra.gmra.mrb[24].mxu0 %vm702_vm0, %v675_v53 }
 0x13c   :  { %1549 = vmatmul.mubr.msk.f32.vlgmr.msra.gmra.mrb[24].mxu1 %vm702_vm0, %v677_v56 }
 0x13d   :  { %v944_v26 = vadd.f32 %v2266_v57, %v920_v59  ;;  %v945_v39 = vadd.f32 %v2253_v19, %v921_v60  ;;  %v946_v4 = vadd.f32 %v937_v1, %v922_v61  ;;  %v947_v6 = vadd.f32 %v2260_v38, %v923_v62  ;;  %v1017_v1 = vpop.permute.xlu1 %1016  ;;  %v695_v38 = vpop.permute.xlu0 %694 }
 0x13f   :  { %v948_v7 = vadd.f32 %v944_v26, %v2269_v46  ;;  %v949_v8 = vadd.f32 %v945_v39, %v2272_v0  ;;  %v950_v11 = vadd.f32 %v946_v4, %v2275_v16  ;;  %v951_v13 = vadd.f32 %v947_v6, %v2278_v3 }
 0x141   :  { %v982_v14 = vmul.f32 %v965_v37, %v948_v7  ;;  %v983_v15 = vmul.f32 %v2283_v10, %v949_v8  ;;  %v984_v47 = vmul.f32 %v975_v52, %v950_v11  ;;  %v985_v21 = vmul.f32 %v980_v17, %v951_v13  ;;  %v1043_v28 = vpop.permute.xlu1 %1042  ;;  %v700_v51 = vpop.permute.xlu0 %699 }
 0x143   :  { %v986_v57 = vadd.f32 %v983_v15, %v982_v14 }
 0x145   :  { %v987_v19 = vadd.f32 %v986_v57, %v984_v47  ;;  %v1076_v31 = vpop.permute.xlu1 %1075  ;;  %v1038_v32 = vpop.permute.xlu0 %1037 }
 0x147   :  { %v988_v23 = vadd.f32 %v987_v19, %v985_v21 }
 0x149   :  { %v989_v24 = vrot.slane %v988_v23, 4  ;;  %v1081_v25 = vpop.permute.xlu1 %1080  ;;  %v1071_v27 = vpop.permute.xlu0 %1070 }
 0x14b   :  { %v990_v46 = vadd.f32 %v989_v24, %v988_v23 }
 0x14d   :  { %v991_v0 = vrot.slane %v990_v46, 2  ;;  %v1048_v61 = vpop.permute.xlu0 %1047 }
 0x14f   :  { %v992_v16 = vadd.f32 %v991_v0, %v990_v46 }
 0x151   :  { %v993_v29 = vrot.slane %v992_v16, 1 }
 0x153   :  { %v994_v3 = vadd.f32 %v993_v29, %v992_v16  ;;  %v1103_v16 = vstv %s2346_s8 }
 0x155   :  { %v998_v10 = vmul.f32 %v994_v3, %v2239_v35  ;;  %v995_v33 = vmul.f32 %v994_v3, %v2219_v63  ;;  %v996_v49 = vmul.f32 %v994_v3, %v2223_v9  ;;  %v997_v34 = vmul.f32 %v994_v3, %v2230_v20  ;;  %v1086_v9 = vpop.permute.xlu1 %1085 }
 0x157   :  { %v1022_v30 = vadd.f32 %v1017_v1, %v998_v10  ;;  %v1019_v5 = vadd.f32 %v1002_v18, %v995_v33  ;;  %v1020_v17 = vadd.f32 %v1007_v54, %v996_v49  ;;  %v1021_v22 = vadd.f32 %v1012_v12, %v997_v34 }
 0x159   :  { %v1023_v36 = vadd.f32 %v1019_v5, %v948_v7  ;;  %v1024_v48 = vadd.f32 %v1020_v17, %v949_v8  ;;  %v1025_v37 = vadd.f32 %v1021_v22, %v950_v11  ;;  %v1026_v58 = vadd.f32 %v1022_v30, %v951_v13 }
 0x15b   :  { %v1088_v40 = vmul.f32 %v1071_v27, %v1023_v36  ;;  %v1089_v41 = vmul.f32 %v1076_v31, %v1024_v48  ;;  %v1369_v42 = vpack.c.bf16 %v1024_v48, %v1023_v36  ;;  %v1374_v35 = vpack.c.bf16 %v1026_v58, %v1025_v37 }
 0x15c   :  { %v1090_v63 = vmul.f32 %v1081_v25, %v1025_v37  ;;  %v1091_v44 = vmul.f32 %v1086_v9, %v1026_v58 }
 0x15d   :  { %v1092_v43 = vadd.f32 %v1089_v41, %v1088_v40  ;;  %1379 = vst [vmem:[%s2345_s10 + $0x20] sm:$0xff] %v1369_v42   ;;  %1380 = vst [vmem:[%s2345_s10 + $0x28] sm:$0xff] %v1374_v35  }
 0x15f   :  { %v1093_v20 = vadd.f32 %v1092_v43, %v1090_v63 }
 0x161   :  { %v1094_v52 = vadd.f32 %v1093_v20, %v1091_v44 }
 0x163   :  { %v1095_v39 = vrot.slane %v1094_v52, 4 }
 0x165   :  { %v1096_v14 = vadd.f32 %v1095_v39, %v1094_v52 }
 0x167   :  { %v1097_v57 = vrot.slane %v1096_v14, 2 }
 0x169   :  { %v1098_v1 = vadd.f32 %v1097_v57, %v1096_v14 }
 0x16b   :  { %v1099_v24 = vrot.slane %v1098_v1, 1 }
 0x16d   :  { %v1100_v0 = vadd.f32 %v1099_v24, %v1098_v1 }
 0x20e   :  { %v1547_v55 = vpop.f32.mrb[24].mxu0 }
 0x20f   :  { %v787_v53 = vadd.f32 %v1547_v55, %v2292_v45  ;;  %v1550_v50 = vpop.f32.mrb[24].mxu1  ;;  %v781_v56 = vpop.f32.mrb[25].mxu0 }
 0x210   :  { %v797_v54 = vadd.f32 %v1550_v50, %v700_v51  ;;  %v782_v59 = vadd.f32 %v781_v56, %v685_v2  ;;  %v791_v60 = vpop.f32.mrb[25].mxu1  ;;  %v1053_v2 = vpop.permute.xlu0 %1052 }
 0x211   :  { %v801_v62 = vmax.f32 %v787_v53, 0.0  ;;  %v792_v26 = vadd.f32 %v791_v60, %v695_v38 }
 0x212   :  { %v803_v4 = vmax.f32 %v797_v54, 0.0  ;;  %v800_v6 = vmax.f32 %v782_v59, 0.0 }
 0x213   :  { %v1056_v7 = vmul.f32 %v1043_v28, %v801_v62  ;;  %v802_v8 = vmax.f32 %v792_v26, 0.0 }
 0x214   :  { %v1055_v11 = vmul.f32 %v1038_v32, %v800_v6  ;;  %v1359_v12 = vpack.c.bf16 %v801_v62, %v800_v6  ;;  %v1058_v18 = vmul.f32 %v1053_v2, %v803_v4 }
 0x215   :  { %v1364_v13 = vpack.c.bf16 %v803_v4, %v802_v8  ;;  %v1057_v45 = vmul.f32 %v1048_v61, %v802_v8 }
 0x216   :  { %v1059_v15 = vadd.f32 %v1056_v7, %v1055_v11  ;;  %1377 = vst [vmem:[%s2345_s10 + $0x10] sm:$0xff] %v1359_v12  }
 0x217   :  { %1378 = vst [vmem:[%s2345_s10 + $0x18] sm:$0xff] %v1364_v13  }
 0x218   :  { %v1060_v47 = vadd.f32 %v1059_v15, %v1057_v45 }
 0x21a   :  { %v1061_v21 = vadd.f32 %v1060_v47, %v1058_v18 }
 0x21c   :  { %v1062_v19 = vrot.slane %v1061_v21, 4 }
 0x21e   :  { %v1063_v23 = vadd.f32 %v1062_v19, %v1061_v21 }
 0x220   :  { %v1064_v38 = vrot.slane %v1063_v23, 2 }
 0x222   :  { %v1065_v46 = vadd.f32 %v1064_v38, %v1063_v23 }
 0x224   :  { %v1066_v28 = vrot.slane %v1065_v46, 1 }
 0x226   :  { %v1067_v51 = vadd.f32 %v1066_v28, %v1065_v46 }
 0x228   :  { %v1101_v29 = vadd.f32 %v1100_v0, %v1067_v51 }
 0x22a   :  { %v1104_v31 = vadd.f32 %v1103_v16, %v1101_v29 }
 0x22c   :  { %1105 = vst [vmem:[%s2347_s9] sm:$0x1] %v1104_v31 }

</bundles_post_ra>
